<compile_context>
chip_gen: v7x
topology: tpu7x:2x2x1
jax: 0.10.0
libtpu: 0.0.40
codegen_flags: <defaults>
</compile_context>

<pallas_src>
import functools

import jax
import jax.numpy as jnp
import numpy as np
from jax.experimental import pallas as pl
from jax.experimental.pallas import tpu as pltpu


# ---------------------------------------------------------------------------
# VMEM budgeting (generation-aware)
# ---------------------------------------------------------------------------
def _vmem_capacity_bytes():
    try:
        return int(pltpu.get_tpu_info().vmem_capacity_bytes)
    except Exception:
        return 64 << 20  # conservative default (v7x per-TensorCore)


def _vmem_budgets():
    cap = _vmem_capacity_bytes()
    # v5e/v6e (128 MiB) -> 96 MiB limit; v7x (64 MiB) -> 48 MiB limit.
    limit = min((cap * 3) // 4, 96 << 20)
    limit = max(limit, 16 << 20)
    tile_budget = limit // 2  # headroom for double buffers / compiler scratch
    return limit, tile_budget


def _largest_divisor_le(n, cap):
    cap = max(1, min(int(cap), n))
    best = 1
    for d in range(1, n + 1):
        if n % d == 0 and d <= cap:
            best = d
    return best


# ---------------------------------------------------------------------------
# Fused path: conv3x3 + PixelUnshuffle folded into one (16*C, 4*C_out) matmul
# ---------------------------------------------------------------------------
def _build_fused_weight(weight_oihw):
    """OIHW (C_out, C_in, 3, 3) -> (16*C_in, 4*C_out) fused conv+unshuffle weight.

    K axis ordered (py, px, c_in) over the 4x4 input window of one 2x2 output
    block; N axis ordered c_out*4 + i*2 + j (PyTorch PixelUnshuffle order).
    Structured zeros (9/16 dense): trades 16/9 extra MACs for up to 4x better
    MXU column utilization when C_out is small.
    """
    C_out, C_in = weight_oihw.shape[0], weight_oihw.shape[1]
    w_k = jnp.transpose(weight_oihw, (2, 3, 1, 0))        # (ky, kx, c_in, c_out)
    blocks = []
    for i in range(2):
        for j in range(2):
            # place w_k[ky, kx] at window position (py, px) = (ky + i, kx + j)
            blocks.append(jnp.pad(w_k, ((i, 1 - i), (j, 1 - j), (0, 0), (0, 0))))
    w16 = jnp.stack(blocks, axis=-1)                       # (4, 4, C_in, C_out, 4)
    return w16.reshape(16 * C_in, 4 * C_out)


def _downsample_fused_kernel(x_top_ref, x_mid_ref, x_bot_ref, w_ref, o_ref,
                             xpad_ref, *, total_rows):
    """One (batch n, row-tile t) step.

    x_top_ref: (1, 1, W2, 2C)   row above the tile (content ignored when t == 0)
    x_mid_ref: (1, TH, W2, 2C)  the tile's rows, TH = 2*TH2 (may be partial at tail)
    x_bot_ref: (1, 1, W2, 2C)   row below the tile (content ignored on last tile)
    w_ref:     (16*C, 4*C_out)  fused conv+unshuffle weight
    o_ref:     (1, TH2, W2, 4*C_out)  lanes already in torch order c_out*4+i*2+j
    xpad_ref:  VMEM scratch (TH+2, W2+2, 2C): padded tile, lanes = (col parity, c_in)
    """
    t = pl.program_id(1)
    num_t = pl.num_programs(1)

    TH = x_mid_ref.shape[1]
    C2 = x_mid_ref.shape[3]          # 2 * C_in
    C = C2 // 2
    TH2 = o_ref.shape[1]
    W2 = o_ref.shape[2]
    Co4 = o_ref.shape[3]             # 4 * C_out
    dt = x_mid_ref.dtype

    # ---- assemble the zero-padded tile in the persistent VMEM scratch ----
    # (plain ref stores; no concatenate-built copies of the whole tile)
    zcol = jnp.zeros((TH + 2, 1, C2), dt)
    xpad_ref[pl.ds(0, TH + 2), pl.ds(0, 1), :] = zcol            # left col pad
    xpad_ref[pl.ds(0, TH + 2), pl.ds(W2 + 1, 1), :] = zcol       # right col pad

    xpad_ref[pl.ds(1, TH), pl.ds(1, W2), :] = x_mid_ref[0]       # tile rows

    zrow = jnp.zeros((1, W2, C2), dt)

    @pl.when(t == 0)
    def _():                                                     # image top border
        xpad_ref[pl.ds(0, 1), pl.ds(1, W2), :] = zrow

    @pl.when(t > 0)
    def _():                                                     # real top halo
        xpad_ref[pl.ds(0, 1), pl.ds(1, W2), :] = x_top_ref[0]

    # Row just below the last valid input row: real halo for interior tiles,
    # the conv's zero padding for the (possibly partial) last tile.
    v = jnp.minimum(TH, total_rows - t * TH)                     # valid rows here

    @pl.when(t < num_t - 1)
    def _():
        xpad_ref[pl.ds(TH + 1, 1), pl.ds(1, W2), :] = x_bot_ref[0]

    @pl.when(t == num_t - 1)
    def _():
        xpad_ref[pl.ds(v + 1, 1), pl.ds(1, W2), :] = zrow

    # ---- im2col over 2x2 output blocks -> patch (TH2*W2, 16*C) ----
    # Row-parity split is a free leading-dim reshape; every slice below is a
    # contiguous unit-stride window (no stride-2 gathers in VMEM).
    xt = xpad_ref[...].reshape(TH2 + 1, 2, W2 + 2, C2)
    slabs = (xt[0:TH2, 0],        # py = 0
             xt[0:TH2, 1],        # py = 1
             xt[1:TH2 + 1, 0],    # py = 2
             xt[1:TH2 + 1, 1])    # py = 3
    taps = []
    for slab in slabs:                            # slab: (TH2, W2+2, 2C)
        taps.append(slab[:, 0:W2, C:C2])          # px = 0 (left neighbour, parity 1)
        taps.append(slab[:, 1:W2 + 1, :])         # px = 1, 2 (own column pair)
        taps.append(slab[:, 2:W2 + 2, 0:C])       # px = 3 (right neighbour, parity 0)
    patch = jnp.concatenate(taps, axis=-1)        # (TH2, W2, 16*C), K = (py, px, c)
    patch = patch.reshape(TH2 * W2, 16 * C)

    # ---- single MXU contraction; lanes already in torch PixelUnshuffle order ----
    y = jnp.dot(patch, w_ref[...], preferred_element_type=jnp.float32)
    y = y.astype(o_ref.dtype)                     # cast early: halves store-path traffic
    o_ref[0] = y.reshape(TH2, W2, Co4)


def _pick_tile_h2_fused(N, H2, W2, C, C_out, itemsize, budget_bytes):
    """Largest TH2 whose estimated per-step working set fits the budget."""
    C2 = 2 * C
    in_row = 2 * W2 * C2 * itemsize               # two input rows
    patch_row = 4 * W2 * C2 * itemsize            # im2col blow-up is 4x the tile
    out_row = W2 * 4 * C_out * itemsize
    row_bytes = (2 * in_row                       # mid block (double-buffered)
                 + in_row                         # padded scratch
                 + in_row                         # xt value
                 + 2 * patch_row                  # patch + concat transients
                 + W2 * 4 * C_out * 4             # f32 matmul result
                 + 2 * out_row)                   # output block (double-buffered)
    fixed = 2 * (16 * C * 4 * C_out * itemsize)   # weight (double-buffered)
    fixed += 2 * 2 * W2 * C2 * itemsize           # halo rows
    avail = budget_bytes - fixed
    th2 = max(1, min(H2, avail // max(row_bytes, 1)))
    if N == 1 and H2 >= 2:
        # keep >= 2 parallel grid steps so both v7x TensorCores get work
        th2 = min(th2, -(-H2 // 2))
    return int(th2)


def _forward_fused(x_nchw, weight_oihw, tile_h2, vmem_limit, tile_budget):
    N, C, H, W = x_nchw.shape
    C_out = weight_oihw.shape[0]
    H2, W2 = H // 2, W // 2

    # NCHW -> NHWC once; the (W2, 2C) view is a free reshape that pre-splits
    # the column parity onto the lane axis.
    # TODO(synk): if the surrounding model keeps activations NHWC end-to-end,
    # this transpose (and the final one) disappears entirely.
    x_ph = jnp.transpose(x_nchw, (0, 2, 3, 1)).reshape(N, H, W2, 2 * C)

    w_fused = _build_fused_weight(weight_oihw).astype(x_nchw.dtype)  # (16C, 4C_out)

    if tile_h2 is None:
        tile_h2 = _pick_tile_h2_fused(N, H2, W2, C, C_out,
                                      x_nchw.dtype.itemsize, tile_budget)
    TH2 = max(1, min(int(tile_h2), H2))
    TH = 2 * TH2
    T = pl.cdiv(H2, TH2)                           # non-divisor tiles OK (masked tail)

    kernel = functools.partial(_downsample_fused_kernel, total_rows=H)

    def top_map(n, t):   # 1-row blocks along H: block index == row index
        return (n, jnp.maximum(t * TH - 1, 0), 0, 0)

    def bot_map(n, t):
        return (n, jnp.minimum(t * TH + TH, H - 1), 0, 0)

    out_nhwc = pl.pallas_call(
        kernel,
        out_shape=jax.ShapeDtypeStruct((N, H2, W2, 4 * C_out), x_nchw.dtype),
        grid_spec=pltpu.PrefetchScalarGridSpec(
            num_scalar_prefetch=0,
            grid=(N, T),
            in_specs=[
                pl.BlockSpec((1, 1, W2, 2 * C), top_map),               # halo above
                pl.BlockSpec((1, TH, W2, 2 * C), lambda n, t: (n, t, 0, 0)),
                pl.BlockSpec((1, 1, W2, 2 * C), bot_map),               # halo below
                pl.BlockSpec((16 * C, 4 * C_out), lambda n, t: (0, 0)),  # weight
            ],
            out_specs=pl.BlockSpec((1, TH2, W2, 4 * C_out),
                                   lambda n, t: (n, t, 0, 0)),
            scratch_shapes=[pltpu.VMEM((TH + 2, W2 + 2, 2 * C), x_nchw.dtype)],
        ),
        compiler_params=pltpu.CompilerParams(
            dimension_semantics=("parallel", "parallel"),
            vmem_limit_bytes=int(vmem_limit),
        ),
    )(x_ph, x_ph, x_ph, w_fused)

    # Channels already in PyTorch PixelUnshuffle order (c_out*4 + i*2 + j):
    # a single NHWC -> NCHW transpose finishes the op.
    return jnp.transpose(out_nhwc, (0, 3, 1, 2))


# ---------------------------------------------------------------------------
# Fallback path (large C_out): exact K = 9*C contraction, unshuffle after dot
# ---------------------------------------------------------------------------
def _downsample_split_kernel(x_top_ref, x_mid_ref, x_bot_ref, w_ref, o_ref):
    t = pl.program_id(1)
    num_t = pl.num_programs(1)

    TH, W, C = x_mid_ref.shape[1], x_mid_ref.shape[2], x_mid_ref.shape[3]
    TH2, W2 = o_ref.shape[1], o_ref.shape[2]
    C_out = w_ref.shape[1]
    dt = x_mid_ref.dtype

    zero_row = jnp.zeros((1, W, C), dt)
    top = jnp.where(t > 0, x_top_ref[0], zero_row)
    bot = jnp.where(t < num_t - 1, x_bot_ref[0], zero_row)

    xt = jnp.concatenate([top, x_mid_ref[0], bot], axis=0)      # (TH+2, W, C)
    zero_col = jnp.zeros((TH + 2, 1, C), dt)
    xt = jnp.concatenate([zero_col, xt, zero_col], axis=1)      # (TH+2, W+2, C)

    taps = [xt[dy:dy + TH, dx:dx + W, :] for dy in range(3) for dx in range(3)]
    patch = jnp.concatenate(taps, axis=-1).reshape(TH * W, 9 * C)

    y = jnp.dot(patch, w_ref[...], preferred_element_type=jnp.float32)
    y = y.astype(o_ref.dtype)                    # cast before the unshuffle relayout
    y = y.reshape(TH2, 2, W2, 2 * C_out)         # (h2, i, w2, (j, c_out))
    y = jnp.concatenate([y[:, 0], y[:, 1]], axis=-1)             # (TH2, W2, 4*C_out)
    o_ref[0] = y


def _pick_tile_h2_split(H2, W, C, itemsize, budget_bytes):
    bytes_per_h2_row = 2 * W * C * itemsize * 14 + 1
    return _largest_divisor_le(H2, budget_bytes // bytes_per_h2_row)


def _forward_split(x_nchw, weight_oihw, tile_h2, vmem_limit, tile_budget):
    N, C, H, W = x_nchw.shape
    C_out = weight_oihw.shape[0]
    H2, W2 = H // 2, W // 2

    x_nhwc = jnp.transpose(x_nchw, (0, 2, 3, 1))
    w_fused = jnp.transpose(weight_oihw, (2, 3, 1, 0)).reshape(9 * C, C_out)
    w_fused = w_fused.astype(x_nchw.dtype)

    if tile_h2 is None:
        tile_h2 = _pick_tile_h2_split(H2, W, C, x_nchw.dtype.itemsize, tile_budget)
    TH2 = _largest_divisor_le(H2, tile_h2)
    TH = 2 * TH2
    T = H2 // TH2

    def mid_map(n, t):
        return (n, t, 0, 0)

    def top_map(n, t):
        return (n, jnp.maximum(t * TH - 1, 0), 0, 0)

    def bot_map(n, t):
        return (n, jnp.minimum(t * TH + TH, H - 1), 0, 0)

    out5 = pl.pallas_call(
        _downsample_split_kernel,
        out_shape=jax.ShapeDtypeStruct((N, H2, W2, 4 * C_out), x_nchw.dtype),
        grid_spec=pltpu.PrefetchScalarGridSpec(
            num_scalar_prefetch=0,
            grid=(N, T),
            in_specs=[
                pl.BlockSpec((1, 1, W, C), top_map),
                pl.BlockSpec((1, TH, W, C), mid_map),
                pl.BlockSpec((1, 1, W, C), bot_map),
                pl.BlockSpec((9 * C, C_out), lambda n, t: (0, 0)),
            ],
            out_specs=pl.BlockSpec((1, TH2, W2, 4 * C_out), lambda n, t: (n, t, 0, 0)),
        ),
        compiler_params=pltpu.CompilerParams(
            dimension_semantics=("parallel", "parallel"),
            vmem_limit_bytes=int(vmem_limit),
        ),
    )(x_nhwc, x_nhwc, x_nhwc, w_fused)

    # Kernel lanes are (i, j, c_out); reorder to PyTorch's c_out*4 + i*2 + j
    # while doing the NHWC -> NCHW transpose.
    y = out5.reshape(N, H2, W2, 2, 2, C_out)
    y = jnp.transpose(y, (0, 5, 3, 4, 1, 2))
    return y.reshape(N, 4 * C_out, H2, W2)


# ---------------------------------------------------------------------------
# Public entry point (matches DownSample.forward)
# ---------------------------------------------------------------------------
def downsample_forward(x_nchw, weight_oihw, *, tile_h2=None, fuse_unshuffle=None):
    """Conv2d(C, C//2, 3, padding=1, bias=False) + PixelUnshuffle(2).

    x_nchw:      (N, C, H, W)
    weight_oihw: (C//2, C, 3, 3)   (PyTorch conv weight layout)
    returns:     (N, 2*C, H//2, W//2)
    """
    N, C, H, W = x_nchw.shape
    C_out = weight_oihw.shape[0]
    assert weight_oihw.shape == (C_out, C, 3, 3)
    assert H % 2 == 0 and W % 2 == 0

    vmem_limit, tile_budget = _vmem_budgets()

    if fuse_unshuffle is None:
        # Fold PixelUnshuffle into the contraction while 4*C_out still brings
        # extra MXU column utilization; for very large C_out the exact 9*C
        # contraction already saturates MXU columns and the 16/9 extra MACs
        # would be a pure loss.
        fuse_unshuffle = C_out <= 128

    if fuse_unshuffle:
        return _forward_fused(x_nchw, weight_oihw, tile_h2, vmem_limit, tile_budget)
    return _forward_split(x_nchw, weight_oihw, tile_h2, vmem_limit, tile_budget)


# ---------------------------------------------------------------------------
# Reference + self-test
# ---------------------------------------------------------------------------
def _pixel_unshuffle_ref(x_nchw, r):
    # output[n, c*r*r + i*r + j, h, w] = input[n, c, h*r + i, w*r + j]
    N, C, H, W = x_nchw.shape
    x = x_nchw.reshape(N, C, H // r, r, W // r, r)
    x = jnp.transpose(x, (0, 1, 3, 5, 2, 4))
    return x.reshape(N, C * r * r, H // r, W // r)


if __name__ == "__main__":
    key = jax.random.PRNGKey(0)
    kx, kw = jax.random.split(key)

    N, C, H, W = 2, 4, 16, 16
    x = jax.random.normal(kx, (N, C, H, W), dtype=jnp.float32)
    weight = jax.random.normal(kw, (C // 2, C, 3, 3), dtype=jnp.float32) * 0.1

    # Pure-JAX reference (XLA conv + pixel-unshuffle).
    ref_conv = jax.lax.conv_general_dilated(
        x, weight, window_strides=(1, 1), padding=((1, 1), (1, 1)),
        dimension_numbers=('NCHW', 'OIHW', 'NCHW'))
    ref = _pixel_unshuffle_ref(ref_conv, 2)

    # (a) fused path, non-divisor tile height: exercises the zero-pad top/bottom
    #     rows, real interior halos, and the masked partial last tile.
    out_a = jax.block_until_ready(downsample_forward(x, weight, tile_h2=3))
    # (b) fused path, auto (generation-aware) tile size.
    out_b = jax.block_until_ready(downsample_forward(x, weight))
    # (c) 9*C fallback path (used when C_out is large), divisor tile.
    out_c = jax.block_until_ready(
        downsample_forward(x, weight, tile_h2=4, fuse_unshuffle=False))

    for out in (out_a, out_b, out_c):
        assert out.shape == (N, 2 * C, H // 2, W // 2), out.shape
        np.testing.assert_allclose(np.asarray(out), np.asarray(ref),
                                   rtol=1e-5, atol=2e-5)

    print("KERNEL_OK")
</pallas_src>

<mosaic_0001>
module attributes {stable_mosaic.version = 11 : i64} {
  func.func @_downsample_fused_kernel(%arg0: i32, %arg1: i32, %arg2: memref<1x1x8x8xf32, #tpu.memory_space<vmem>>, %arg3: memref<1x6x8x8xf32, #tpu.memory_space<vmem>>, %arg4: memref<1x1x8x8xf32, #tpu.memory_space<vmem>>, %arg5: memref<64x8xf32, #tpu.memory_space<vmem>>, %arg6: memref<1x3x8x8xf32, #tpu.memory_space<vmem>>, %arg7: memref<8x10x8xf32, #tpu.memory_space<vmem>>) attributes {dimension_semantics = [#tpu.dimension_semantics<parallel>, #tpu.dimension_semantics<parallel>], iteration_bounds = array<i64: 2, 3>, scalar_prefetch = 0 : i64, scratch_operands = 1 : i64, tpu.core_type = #tpu.core_type<tc>, window_params = [{transform_indices = @transform_0, window_bounds = array<i64: 1, 1, 8, 8>}, {transform_indices = @transform_1, window_bounds = array<i64: 1, 6, 8, 8>}, {transform_indices = @transform_2, window_bounds = array<i64: 1, 1, 8, 8>}, {pipeline_mode = #tpu.pipeline_mode<synchronous>, transform_indices = @transform_3, window_bounds = array<i64: 64, 8>}, {transform_indices = @transform_4, window_bounds = array<i64: 1, 3, 8, 8>}]} {
    %cst = arith.constant 0.000000e+00 : f32
    %0 = vector.broadcast %cst : f32 to vector<8x1x8xf32>
    %c0 = arith.constant 0 : index
    %c0_0 = arith.constant 0 : index
    %c0_1 = arith.constant 0 : index
    %1 = vector.load %arg7[%c0, %c0_0, %c0_1] : memref<8x10x8xf32, #tpu.memory_space<vmem>>, vector<8x1x8xf32>
    tpu.vector_store %arg7[%c0, %c0_0, %c0_1], %0 {strides = array<i32>} : memref<8x10x8xf32, #tpu.memory_space<vmem>>, vector<8x1x8xf32>,
    %c0_2 = arith.constant 0 : index
    %c9 = arith.constant 9 : index
    %c0_3 = arith.constant 0 : index
    %2 = vector.load %arg7[%c0_2, %c9, %c0_3] : memref<8x10x8xf32, #tpu.memory_space<vmem>>, vector<8x1x8xf32>
    tpu.vector_store %arg7[%c0_2, %c9, %c0_3], %0 {strides = array<i32>} : memref<8x10x8xf32, #tpu.memory_space<vmem>>, vector<8x1x8xf32>,
    %c0_4 = arith.constant 0 : index
    %c0_5 = arith.constant 0 : index
    %c0_6 = arith.constant 0 : index
    %c0_7 = arith.constant 0 : index
    %3 = vector.load %arg3[%c0_4, %c0_5, %c0_6, %c0_7] : memref<1x6x8x8xf32, #tpu.memory_space<vmem>>, vector<1x6x8x8xf32>
    %4 = vector.shape_cast %3 : vector<1x6x8x8xf32> to vector<6x8x8xf32>
    %c1 = arith.constant 1 : index
    %c1_8 = arith.constant 1 : index
    %c0_9 = arith.constant 0 : index
    %5 = vector.load %arg7[%c1, %c1_8, %c0_9] : memref<8x10x8xf32, #tpu.memory_space<vmem>>, vector<6x8x8xf32>
    tpu.vector_store %arg7[%c1, %c1_8, %c0_9], %4 {strides = array<i32>} : memref<8x10x8xf32, #tpu.memory_space<vmem>>, vector<6x8x8xf32>,
    %cst_10 = arith.constant 0.000000e+00 : f32
    %6 = vector.broadcast %cst_10 : f32 to vector<1x8x8xf32>
    %c0_i32 = arith.constant 0 : i32
    %7 = arith.cmpi eq, %arg1, %c0_i32 : i32
    %8 = arith.extui %7 : i1 to i32
    %c0_i32_11 = arith.constant 0 : i32
    %9 = arith.cmpi ne, %8, %c0_i32_11 : i32
    scf.if %9 {
      %c0_28 = arith.constant 0 : index
      %c1_29 = arith.constant 1 : index
      %c0_30 = arith.constant 0 : index
      %52 = vector.load %arg7[%c0_28, %c1_29, %c0_30] : memref<8x10x8xf32, #tpu.memory_space<vmem>>, vector<1x8x8xf32>
      tpu.vector_store %arg7[%c0_28, %c1_29, %c0_30], %6 {strides = array<i32>} : memref<8x10x8xf32, #tpu.memory_space<vmem>>, vector<1x8x8xf32>,
    } else {
    }
    %c0_i32_12 = arith.constant 0 : i32
    %10 = arith.cmpi sgt, %arg1, %c0_i32_12 : i32
    %11 = arith.extui %10 : i1 to i32
    %c0_i32_13 = arith.constant 0 : i32
    %12 = arith.cmpi ne, %11, %c0_i32_13 : i32
    scf.if %12 {
      %c0_28 = arith.constant 0 : index
      %c0_29 = arith.constant 0 : index
      %c0_30 = arith.constant 0 : index
      %c0_31 = arith.constant 0 : index
      %52 = vector.load %arg2[%c0_28, %c0_29, %c0_30, %c0_31] : memref<1x1x8x8xf32, #tpu.memory_space<vmem>>, vector<1x1x8x8xf32>
      %53 = vector.shape_cast %52 : vector<1x1x8x8xf32> to vector<1x8x8xf32>
      %c0_32 = arith.constant 0 : index
      %c1_33 = arith.constant 1 : index
      %c0_34 = arith.constant 0 : index
      %54 = vector.load %arg7[%c0_32, %c1_33, %c0_34] : memref<8x10x8xf32, #tpu.memory_space<vmem>>, vector<1x8x8xf32>
      tpu.vector_store %arg7[%c0_32, %c1_33, %c0_34], %53 {strides = array<i32>} : memref<8x10x8xf32, #tpu.memory_space<vmem>>, vector<1x8x8xf32>,
    } else {
    }
    %c6_i32 = arith.constant 6 : i32
    %13 = arith.muli %arg1, %c6_i32 : i32
    %c16_i32 = arith.constant 16 : i32
    %14 = arith.subi %c16_i32, %13 : i32
    %c6_i32_14 = arith.constant 6 : i32
    %15 = arith.minsi %c6_i32_14, %14 : i32
    %c2_i32 = arith.constant 2 : i32
    %16 = arith.cmpi slt, %arg1, %c2_i32 : i32
    %17 = arith.extui %16 : i1 to i32
    %c0_i32_15 = arith.constant 0 : i32
    %18 = arith.cmpi ne, %17, %c0_i32_15 : i32
    scf.if %18 {
      %c0_28 = arith.constant 0 : index
      %c0_29 = arith.constant 0 : index
      %c0_30 = arith.constant 0 : index
      %c0_31 = arith.constant 0 : index
      %52 = vector.load %arg4[%c0_28, %c0_29, %c0_30, %c0_31] : memref<1x1x8x8xf32, #tpu.memory_space<vmem>>, vector<1x1x8x8xf32>
      %53 = vector.shape_cast %52 : vector<1x1x8x8xf32> to vector<1x8x8xf32>
      %c7 = arith.constant 7 : index
      %c1_32 = arith.constant 1 : index
      %c0_33 = arith.constant 0 : index
      %54 = vector.load %arg7[%c7, %c1_32, %c0_33] : memref<8x10x8xf32, #tpu.memory_space<vmem>>, vector<1x8x8xf32>
      tpu.vector_store %arg7[%c7, %c1_32, %c0_33], %53 {strides = array<i32>} : memref<8x10x8xf32, #tpu.memory_space<vmem>>, vector<1x8x8xf32>,
    } else {
    }
    %c2_i32_16 = arith.constant 2 : i32
    %19 = arith.cmpi eq, %arg1, %c2_i32_16 : i32
    %20 = arith.extui %19 : i1 to i32
    %c0_i32_17 = arith.constant 0 : i32
    %21 = arith.cmpi ne, %20, %c0_i32_17 : i32
    scf.if %21 {
      %c1_i32 = arith.constant 1 : i32
      %52 = arith.addi %15, %c1_i32 : i32
      %53 = arith.index_cast %52 : i32 to index
      %c1_28 = arith.constant 1 : index
      %c0_29 = arith.constant 0 : index
      %54 = vector.load %arg7[%53, %c1_28, %c0_29] : memref<8x10x8xf32, #tpu.memory_space<vmem>>, vector<1x8x8xf32>
      tpu.vector_store %arg7[%53, %c1_28, %c0_29], %6 {strides = array<i32>} : memref<8x10x8xf32, #tpu.memory_space<vmem>>, vector<1x8x8xf32>,
    } else {
    }
    %c0_18 = arith.constant 0 : index
    %c0_19 = arith.constant 0 : index
    %c0_20 = arith.constant 0 : index
    %22 = vector.load %arg7[%c0_18, %c0_19, %c0_20] : memref<8x10x8xf32, #tpu.memory_space<vmem>>, vector<8x10x8xf32>
    %23 = vector.shape_cast %22 : vector<8x10x8xf32> to vector<4x2x10x8xf32>
    %24 = vector.extract_strided_slice %23 {offsets = [0, 0, 0, 0], sizes = [3, 1, 10, 8], strides = [1, 1, 1, 1]} : vector<4x2x10x8xf32> to vector<3x1x10x8xf32>
    %25 = vector.shape_cast %24 : vector<3x1x10x8xf32> to vector<3x10x8xf32>
    %26 = vector.extract_strided_slice %23 {offsets = [0, 1, 0, 0], sizes = [3, 1, 10, 8], strides = [1, 1, 1, 1]} : vector<4x2x10x8xf32> to vector<3x1x10x8xf32>
    %27 = vector.shape_cast %26 : vector<3x1x10x8xf32> to vector<3x10x8xf32>
    %28 = vector.extract_strided_slice %23 {offsets = [1, 0, 0, 0], sizes = [3, 1, 10, 8], strides = [1, 1, 1, 1]} : vector<4x2x10x8xf32> to vector<3x1x10x8xf32>
    %29 = vector.shape_cast %28 : vector<3x1x10x8xf32> to vector<3x10x8xf32>
    %30 = vector.extract_strided_slice %23 {offsets = [1, 1, 0, 0], sizes = [3, 1, 10, 8], strides = [1, 1, 1, 1]} : vector<4x2x10x8xf32> to vector<3x1x10x8xf32>
    %31 = vector.shape_cast %30 : vector<3x1x10x8xf32> to vector<3x10x8xf32>
    %32 = vector.extract_strided_slice %25 {offsets = [0, 0, 4], sizes = [3, 8, 4], strides = [1, 1, 1]} : vector<3x10x8xf32> to vector<3x8x4xf32>
    %33 = vector.extract_strided_slice %25 {offsets = [0, 1, 0], sizes = [3, 8, 8], strides = [1, 1, 1]} : vector<3x10x8xf32> to vector<3x8x8xf32>
    %34 = vector.extract_strided_slice %25 {offsets = [0, 2, 0], sizes = [3, 8, 4], strides = [1, 1, 1]} : vector<3x10x8xf32> to vector<3x8x4xf32>
    %35 = vector.extract_strided_slice %27 {offsets = [0, 0, 4], sizes = [3, 8, 4], strides = [1, 1, 1]} : vector<3x10x8xf32> to vector<3x8x4xf32>
    %36 = vector.extract_strided_slice %27 {offsets = [0, 1, 0], sizes = [3, 8, 8], strides = [1, 1, 1]} : vector<3x10x8xf32> to vector<3x8x8xf32>
    %37 = vector.extract_strided_slice %27 {offsets = [0, 2, 0], sizes = [3, 8, 4], strides = [1, 1, 1]} : vector<3x10x8xf32> to vector<3x8x4xf32>
    %38 = vector.extract_strided_slice %29 {offsets = [0, 0, 4], sizes = [3, 8, 4], strides = [1, 1, 1]} : vector<3x10x8xf32> to vector<3x8x4xf32>
    %39 = vector.extract_strided_slice %29 {offsets = [0, 1, 0], sizes = [3, 8, 8], strides = [1, 1, 1]} : vector<3x10x8xf32> to vector<3x8x8xf32>
    %40 = vector.extract_strided_slice %29 {offsets = [0, 2, 0], sizes = [3, 8, 4], strides = [1, 1, 1]} : vector<3x10x8xf32> to vector<3x8x4xf32>
    %41 = vector.extract_strided_slice %31 {offsets = [0, 0, 4], sizes = [3, 8, 4], strides = [1, 1, 1]} : vector<3x10x8xf32> to vector<3x8x4xf32>
    %42 = vector.extract_strided_slice %31 {offsets = [0, 1, 0], sizes = [3, 8, 8], strides = [1, 1, 1]} : vector<3x10x8xf32> to vector<3x8x8xf32>
    %43 = vector.extract_strided_slice %31 {offsets = [0, 2, 0], sizes = [3, 8, 4], strides = [1, 1, 1]} : vector<3x10x8xf32> to vector<3x8x4xf32>
    %44 = tpu.concatenate %32, %33, %34, %35, %36, %37, %38, %39, %40, %41, %42, %43 in 2 : vector<3x8x4xf32>, vector<3x8x8xf32>, vector<3x8x4xf32>, vector<3x8x4xf32>, vector<3x8x8xf32>, vector<3x8x4xf32>, vector<3x8x4xf32>, vector<3x8x8xf32>, vector<3x8x4xf32>, vector<3x8x4xf32>, vector<3x8x8xf32>, vector<3x8x4xf32> -> vector<3x8x64xf32>
    %45 = vector.shape_cast %44 : vector<3x8x64xf32> to vector<24x64xf32>
    %c0_21 = arith.constant 0 : index
    %c0_22 = arith.constant 0 : index
    %46 = vector.load %arg5[%c0_21, %c0_22] : memref<64x8xf32, #tpu.memory_space<vmem>>, vector<64x8xf32>
    %cst_23 = arith.constant dense<0.000000e+00> : vector<24x8xf32>
    %47 = tpu.matmul %45, %46, %cst_23 {dimension_numbers = #tpu.dot_dimension_numbers<[1], [0], [0], [1], [0, 0, 1, 1], [], []>} : vector<24x64xf32>, vector<64x8xf32>, vector<24x8xf32> -> vector<24x8xf32>
    %48 = vector.shape_cast %47 : vector<24x8xf32> to vector<3x8x8xf32>
    %c0_24 = arith.constant 0 : index
    %c0_25 = arith.constant 0 : index
    %c0_26 = arith.constant 0 : index
    %c0_27 = arith.constant 0 : index
    %49 = vector.load %arg6[%c0_24, %c0_25, %c0_26, %c0_27] : memref<1x3x8x8xf32, #tpu.memory_space<vmem>>, vector<1x3x8x8xf32>
    %50 = vector.shape_cast %49 : vector<1x3x8x8xf32> to vector<3x8x8xf32>
    %51 = vector.shape_cast %48 : vector<3x8x8xf32> to vector<1x3x8x8xf32>
    tpu.vector_store %arg6[%c0_24, %c0_25, %c0_26, %c0_27], %51 {strides = array<i32>} : memref<1x3x8x8xf32, #tpu.memory_space<vmem>>, vector<1x3x8x8xf32>,
    return
  }
  func.func @transform_0(%arg0: i32, %arg1: i32) -> (i32, i32, i32, i32) {
    %c6_i32 = arith.constant 6 : i32
    %0 = arith.muli %arg1, %c6_i32 : i32
    %c1_i32 = arith.constant 1 : i32
    %1 = arith.subi %0, %c1_i32 : i32
    %c0_i32 = arith.constant 0 : i32
    %2 = arith.maxsi %1, %c0_i32 : i32
    %c0_i32_0 = arith.constant 0 : i32
    %c0_i32_1 = arith.constant 0 : i32
    %c0_i32_2 = arith.constant 0 : i32
    return %arg0, %2, %c0_i32_0, %c0_i32_1 : i32, i32, i32, i32
  }
  func.func @transform_1(%arg0: i32, %arg1: i32) -> (i32, i32, i32, i32) {
    %c0_i32 = arith.constant 0 : i32
    %c0_i32_0 = arith.constant 0 : i32
    %c0_i32_1 = arith.constant 0 : i32
    return %arg0, %arg1, %c0_i32, %c0_i32_0 : i32, i32, i32, i32
  }
  func.func @transform_2(%arg0: i32, %arg1: i32) -> (i32, i32, i32, i32) {
    %c6_i32 = arith.constant 6 : i32
    %0 = arith.muli %arg1, %c6_i32 : i32
    %c6_i32_0 = arith.constant 6 : i32
    %1 = arith.addi %0, %c6_i32_0 : i32
    %c15_i32 = arith.constant 15 : i32
    %2 = arith.minsi %1, %c15_i32 : i32
    %c0_i32 = arith.constant 0 : i32
    %c0_i32_1 = arith.constant 0 : i32
    %c0_i32_2 = arith.constant 0 : i32
    return %arg0, %2, %c0_i32, %c0_i32_1 : i32, i32, i32, i32
  }
  func.func @transform_3(%arg0: i32, %arg1: i32) -> (i32, i32) {
    %c0_i32 = arith.constant 0 : i32
    %c0_i32_0 = arith.constant 0 : i32
    %c0_i32_1 = arith.constant 0 : i32
    return %c0_i32, %c0_i32_0 : i32, i32
  }
  func.func @transform_4(%arg0: i32, %arg1: i32) -> (i32, i32, i32, i32) {
    %c0_i32 = arith.constant 0 : i32
    %c0_i32_0 = arith.constant 0 : i32
    %c0_i32_1 = arith.constant 0 : i32
    return %arg0, %arg1, %c0_i32, %c0_i32_0 : i32, i32, i32, i32
  }
}

</mosaic_0001>

<bundles_post_ra>
// kernel: tpu_custom_call.1
= control target key start
LH: loop header
LB: loop body
LE: loop exit
PB: predicated region body
PF: predicated region fallthrough
CT: control target
= control target key end

     0   :  { %9 = vsyncpa [#allocation4], 0  ;;  %s1602_s0 = inlined_call_operand.vmem [shape: f32[2,16,8,8], index: 0, kind: input, shape index: {}]   ;;  %s1603_s1 = inlined_call_operand.vmem [shape: f32[2,16,8,8], index: 1, kind: input, shape index: {}]   ;;  %s1604_s2 = inlined_call_operand.vmem [shape: f32[2,16,8,8], index: 2, kind: input, shape index: {}]   ;;  %s1605_s3 = inlined_call_operand.vmem [shape: f32[64,8], index: 3, kind: input, shape index: {}]   ;;  %s1606_s4 = inlined_call_operand.hbm [shape: f32[2,8,8,8], index: 4, kind: output, shape index: {}]  }
   0x1   :  { %11 = vsyncpa [#allocation4 + $0x1], 0  ;;  %s1230_s15 = smov 0   ;;  %s1232_s16 = smov 0  }
   0x2   :  { %s1234_s17 = smov 0   ;;  %s1236_s18 = smov 0  }
   0x3   :  { %s1238_s19 = smov 0   ;;  %s1240_s20 = smov 0  }
   0x4   :  { %s1242_s21 = smov 0   ;;  %s1244_s22 = smov 0  }
   0x5 LB: > { %1612 = sst [smem:[#allocation6_spill]] %s1178_s20  ;;  %s908_s23 = sadd.s32 4294967295, %s1186_s22   ;;  %s1186_s22 = sphi %s1244_s22, %s17_s22   ;;  %s1182_s21 = sphi %s1242_s21, %s1625_s21   ;;  %s1178_s20 = sphi %s1240_s20, %s1624_s20   ;;  %s1174_s19 = sphi %s1238_s19, %s1623_s19   ;;  %s1170_s18 = sphi %s1236_s18, %s1622_s18   ;;  %s1166_s17 = sphi %s1234_s17, %s1628_s17   ;;  %s1162_s16 = sphi %s1232_s16, %s1627_s16   ;;  %s1158_s15 = sphi %s1230_s15, %s1626_s15  }
   0x6   : > { %1613 = sst [smem:[#allocation7_spill]] %s1182_s21  ;;  %s909_s24 = sadd.s32 4294967294, %s1186_s22  }
   0x7   : > { %s26_s25 = sadd.s32 1, %s1178_s20  ;;  %s29_s26 = sadd.s32 1, %s1182_s21 }
   0x8   : > { %p27_p0 = scmp.ge.s32.totalorder %s26_s25, 3  ;;  %p169_p1 = scmp.ne.s32.totalorder %s1166_s17, %s1162_s16 }
   0x9   : > { %p170_p2 = scmp.eq.s32.totalorder %s908_s23, 5  ;;  %p175_p5 = scmp.ne.s32.totalorder %s1162_s16, %s1158_s15 }
   0xa   : > { %s1630_s25 = smov (%p27_p0, %s26_s25), 0  ;;  %s1632_s26 = smov (!%p27_p0, %s29_s26), %s1182_s21 }
   0xb   : > { %1614 = sst [smem:[#allocation8_spill]] %s1630_s25  ;;  %s155_s27 = ssub.s32 %s1178_s20, %s1630_s25 }
   0xc   : > { %p1281_p3 = por %p170_p2, %p169_p1  ;;  %p31_p4 = scmp.ge.s32.totalorder %s1632_s26, 2 }
   0xd   : > { %p176_p6 = scmp.eq.s32.totalorder %s909_s24, 5  ;;  %p914_p7 = scmp.ge.s32.totalorder %s1186_s22, 1 }
   0xe   : > { %s1634_s26 = smov (%p31_p4, %s1632_s26), 0  ;;  %p256_p9 = scmp.lt.s32.totalorder %s1186_s22, 7 }
   0xf   : > { %1616 = sst [smem:[#allocation9_spill]] %s1634_s26  ;;  %p1290_p8 = por %p176_p6, %p175_p5 }
  0x10   : > { %s154_s30 = ssub.s32 %s1182_s21, %s1634_s26  ;;  %s159_s5 = sadd.s32 1, %s1166_s17 }
  0x11   : > { %s156_s6 = sor.u32 %s155_s27, %s154_s30  ;;  %p257_p10 = pnand %p914_p7, %p256_p9 }
  0x12   : > { %p157_p11 = scmp.eq.s32.totalorder %s156_s6, 0  ;;  %s1607_s8 = sand.u32 (!%p257_p10), 1, %s1162_s16   ;;  %vm369_vm0 = vcmask (!%p257_p10), 57344   ;;  %v1188_v0 = vmov (!%p257_p10), 0.0   ;;  %vm393_vm1 = vcmask (!%p257_p10), 64512  }
  0x13   : > { %260 = sbr.rel (%p257_p10) target bundleno = 498 (0x1f2), region = 36  ;;  %370 = vst.msk [vmem:[#allocation2] sm:$0x1] (!%p257_p10), %vm369_vm0, %v1188_v0  ;;  %371 = vst.msk [vmem:[#allocation2 + $0x10] sm:$0x1] (!%p257_p10), %vm369_vm0, %v1188_v0  ;;  %p318_p12 = scmp.lt.s32.totalorder (!%p257_p10), %s1174_s19, 1 }
  0x14   : > { %s1299_s7 = scalar_select %p157_p11, %s1166_s17, %s159_s5  }
  0x15   : > { %s1303_s9 = smul.u32 (!%p257_p10), 6, %s1170_s18  ;;  %372 = vst.msk [vmem:[#allocation2 + $0x20] sm:$0x1] (!%p257_p10), %vm369_vm0, %v1188_v0  ;;  %373 = vst.msk [vmem:[#allocation2 + $0x30] sm:$0x1] (!%p257_p10), %vm369_vm0, %v1188_v0  ;;  %p930_p4 = scmp.ne.s32.totalorder (!%p257_p10), %s1170_s18, 0 }
  0x16   : > { %1618 = sst [smem:[#allocation10_spill]] %s1299_s7  ;;  %s1307_s10 = smul.u32 (!%p257_p10), 24, %s1607_s8  ;;  %374 = vst.msk [vmem:[#allocation2 + $0x40] sm:$0x1] (!%p257_p10), %vm369_vm0, %v1188_v0  ;;  %375 = vst.msk [vmem:[#allocation2 + $0x50] sm:$0x1] (!%p257_p10), %vm369_vm0, %v1188_v0 }
  0x17   : > { %376 = vst.msk [vmem:[#allocation2 + $0x60] sm:$0x1] (!%p257_p10), %vm369_vm0, %v1188_v0  ;;  %377 = vst.msk [vmem:[#allocation2 + $0x70] sm:$0x1] (!%p257_p10), %vm369_vm0, %v1188_v0  ;;  %s915_s11 = sadd.s32 (!%p257_p10), 4294967295, %s1303_s9  ;;  %p337_p13 = scmp.lt.s32.totalorder (!%p257_p10), %s1303_s9, 15 }
  0x18   : > { %378 = vst.msk [vmem:[#allocation2 + $0x9] sm:$0x1] (!%p257_p10), %vm369_vm0, %v1188_v0  ;;  %379 = vst.msk [vmem:[#allocation2 + $0x19] sm:$0x1] (!%p257_p10), %vm369_vm0, %v1188_v0  ;;  %p316_p0 = scmp.gt.s32.totalorder (!%p257_p10), %s915_s11, 0  ;;  %p916_p1 = scmp.lt.s32.totalorder (!%p257_p10), %s915_s11, 15 }
  0x19   : > { %380 = vst.msk [vmem:[#allocation2 + $0x29] sm:$0x1] (!%p257_p10), %vm369_vm0, %v1188_v0  ;;  %381 = vst.msk [vmem:[#allocation2 + $0x39] sm:$0x1] (!%p257_p10), %vm369_vm0, %v1188_v0  ;;  %s349_s27 = sadd.s32 (!%p257_p10), 6, %s1303_s9 }
  0x1a   : > { %382 = vst.msk [vmem:[#allocation2 + $0x49] sm:$0x1] %vm369_vm0, %v1188_v0  ;;  %383 = vst.msk [vmem:[#allocation2 + $0x59] sm:$0x1] %vm369_vm0, %v1188_v0  ;;  %s319_s12 = scalar_select %p318_p12, %s1174_s19, 1 }
  0x1b   : > { %384 = vst.msk [vmem:[#allocation2 + $0x69] sm:$0x1] %vm369_vm0, %v1188_v0  ;;  %385 = vst.msk [vmem:[#allocation2 + $0x79] sm:$0x1] %vm369_vm0, %v1188_v0  ;;  %s317_s13 = scalar_select %p316_p0, %s915_s11, 0 }
  0x1c   : > { %s921_s14 = sshll.u32 %s319_s12, 4  ;;  %p1356_p2 = scmp.lt.s32.totalorder %s349_s27, 15  ;;  %v1189_v7 = vmov (!%p930_p4), 0.0  }
  0x1d   : > { %s338_s23 = scalar_select %p337_p13, %s1303_s9, 15 }
  0x1e   : > { %s1636_s13 = smov (!%p916_p1, %s317_s13), 15  ;;  %s1638_s27 = smov (!%p1356_p2, %s349_s27), 15 }
  0x1f   : > { %s340_s24 = sadd.s32 %s921_s14, %s338_s23  ;;  %s323_s30 = sadd.s32 %s1636_s13, %s921_s14  ;;  %404 = vst.msk [vmem:[#allocation2 + $0x1] sm:$0xff] (!%p930_p4), %vm393_vm1, %v1189_v7 }
  0x20   : > { %s924_s5 = sshll.u32 %s340_s24, 3  ;;  %s1347_s6 = sshll.u32 %s323_s30, 3 }
  0x21   : > { %s342_s25 = scalar_lea.vmem %s1603_s1, %s924_s5  ;;  %s325_s7 = scalar_lea.vmem %s1602_s0, %s1347_s6 }
  0x22   : > { %v386_v1 = vld [vmem:[%s342_s25] sm:$0xff]  ;;  %v387_v2 = vld [vmem:[%s342_s25 + $0x8] sm:$0xff]  ;;  %v388_v3 = vld [vmem:[%s342_s25 + $0x10] sm:$0xff]  ;;  %s1640_s27 = smov (!%p1356_p2, %s1638_s27), 15  ;;  %s1374_s13 = scalar_lea.vmem [#allocation3], %s1307_s10 }
  0x23   : > { %394 = vst.msk [vmem:[#allocation2 + $0x11] sm:$0xff] %vm393_vm1, %v386_v1  ;;  %395 = vst.msk [vmem:[#allocation2 + $0x21] sm:$0xff] %vm393_vm1, %v387_v2  ;;  %v389_v4 = vld [vmem:[%s342_s25 + $0x18] sm:$0xff]  ;;  %v390_v5 = vld [vmem:[%s342_s25 + $0x20] sm:$0xff]  ;;  %s357_s20 = sadd.s32 %s921_s14, %s1640_s27  ;;  %403 = sbr.rel (%p930_p4) target bundleno = 42 (0x2a), region = 40 }
  0x24   : > { %396 = vst.msk [vmem:[#allocation2 + $0x31] sm:$0xff] %vm393_vm1, %v388_v3  ;;  %v391_v6 = vld [vmem:[%s342_s25 + $0x28] sm:$0xff]  ;;  %397 = vst.msk [vmem:[#allocation2 + $0x41] sm:$0xff] %vm393_vm1, %v389_v4  ;;  %s929_s21 = sshll.u32 %s357_s20, 3 }
  0x25   : > { %398 = vst.msk [vmem:[#allocation2 + $0x51] sm:$0xff] %vm393_vm1, %v390_v5  ;;  %399 = vst.msk [vmem:[#allocation2 + $0x61] sm:$0xff] %vm393_vm1, %v391_v6  ;;  %s359_s12 = scalar_lea.vmem %s1604_s2, %s929_s21 }
  0x2a PF: > { %p931_p5 = scmp.le.s32.totalorder %s1170_s18, 0 }
  0x2b   : > { %v409_v8 = vld [vmem:[%s325_s7] sm:$0xff] (!%p931_p5) }
  0x2c   : > { %408 = sbr.rel (%p931_p5) target bundleno = 51 (0x33), region = 44  ;;  %410 = vst.msk [vmem:[#allocation2 + $0x1] sm:$0xff] (!%p931_p5), %vm393_vm1, %v409_v8 }
  0x33 PF: > { %s412_s25 = ssub.s32 16, %s1303_s9  ;;  %p932_p7 = scmp.ge.s32.totalorder %s1170_s18, 2 }
  0x34   : > { %p413_p6 = scmp.lt.s32.totalorder %s412_s25, 6  ;;  %v419_v9 = vld [vmem:[%s359_s12] sm:$0xff] (!%p932_p7) }
  0x35   : > { %418 = sbr.rel (%p932_p7) target bundleno = 60 (0x3c), region = 48  ;;  %421 = vst.msk [vmem:[#allocation2 + $0x71] sm:$0xff] (!%p932_p7), %vm393_vm1, %v419_v9 }
  0x36   : > { %s1642_s25 = smov (!%p413_p6, %s412_s25), 6 }
  0x3c PF: > { %p933_p9 = scmp.ne.s32.totalorder %s1170_s18, 2 }
  0x3d   : > { %s934_s10 = sshll.u32 (!%p933_p9), %s1642_s25, 4  ;;  %v1190_v10 = vmov (!%p933_p9), 0.0  }
  0x3e   : > { %425 = sbr.rel (%p933_p9) target bundleno = 69 (0x45), region = 52  ;;  %s851_s14 = scalar_lea.vmem (!%p933_p9), [#allocation2], %s934_s10 }
  0x3f   : > { %935 = vst.msk [vmem:[%s851_s14 + $0x11] sm:$0xff] (!%p933_p9), %vm393_vm1, %v1190_v10 }
  0x45 PF: > { %s1191_s7 = smov 12   ;;  %s1192_s9 = smov 124   ;;  %vm480_vm2 = vcmask 1045504   ;;  %vm461_vm3 = vcmask 1046528   ;;  %v664_v47 = vld [vmem:[%s1605_s3] sm:$0xff]  ;;  %v665_v48 = vld [vmem:[%s1605_s3 + $0x8] sm:$0xff] }
  0x46   : > { %v1385_v11 = vld [vmem:[#allocation2 + $0x30] sm:$0xff]  ;;  %v1387_v12 = vld [vmem:[#allocation2 + $0x20] sm:$0xff]  ;;  %v435_v13 = vld [vmem:[#allocation2 + $0x28] sm:$0x3]  ;;  %s1193_s23 = smov 4   ;;  %s1194_s24 = smov 20   ;;  %v986_v49 = vpack.c.bf16 %v665_v48, %v664_v47 }
  0x47   : > { %504 = vrot.lane.b32.xlu1 %v1385_v11, %s1191_s7  ;;  %451 = vrot.lane.b32.xlu0 %v1387_v12, %s1192_s9  ;;  %v484_v14 = vrot.slane %v1387_v12, 2  ;;  %v485_v15 = vrot.slane %v435_v13, 2  ;;  %v465_v16 = vrot.slane %v1387_v12, 1  ;;  %v466_v17 = vrot.slane %v435_v13, 1  ;;  %v437_v18 = vld [vmem:[#allocation2 + $0x38] sm:$0x3] }
  0x48   : > { %v517_v19 = vrot.slane %v1385_v11, 1  ;;  %v518_v21 = vrot.slane %v437_v18, 1  ;;  %v430_v22 = vld [vmem:[#allocation2] sm:$0xff]  ;;  %v431_v23 = vld [vmem:[#allocation2 + $0x8] sm:$0x3]  ;;  %v535_v33 = vrot.slane %v1385_v11, 2 }
  0x49   : > { %v1397_v20 = vsel %vm480_vm2, %v484_v14, %v485_v15  ;;  %v1400_v24 = vsel %vm461_vm3, %v465_v16, %v466_v17  ;;  %v462_v26 = vrot.slane %v430_v22, 1  ;;  %v438_v27 = vld [vmem:[#allocation2 + $0x40] sm:$0xff]  ;;  %v463_v28 = vrot.slane %v431_v23, 1  ;;  %v439_v29 = vld [vmem:[#allocation2 + $0x48] sm:$0x3]  ;;  %s1195_s27 = smov 28  }
  0x4a   : > { %v1406_v25 = vsel %vm461_vm3, %v517_v19, %v518_v21  ;;  %v468_v30 = vrot.slane %v438_v27, 1  ;;  %v469_v32 = vrot.slane %v439_v29, 1  ;;  %v536_v34 = vrot.slane %v437_v18, 2  ;;  %v432_v43 = vld [vmem:[#allocation2 + $0x10] sm:$0xff]  ;;  %v433_v45 = vld [vmem:[#allocation2 + $0x18] sm:$0x3] }
  0x4b   : > { %492 = vrot.lane.b32.xlu1 %v1397_v20, %s1191_s7  ;;  %473 = vrot.lane.b32.xlu0 %v1400_v24, %s1193_s23  ;;  %v464_v31 = vsel %vm461_vm3, %v462_v26, %v463_v28  ;;  %v481_v35 = vrot.slane %v430_v22, 2  ;;  %v482_v36 = vrot.slane %v431_v23, 2  ;;  %v487_v39 = vrot.slane %v438_v27, 2  ;;  %v440_v44 = vld [vmem:[#allocation2 + $0x50] sm:$0xff]  ;;  %v441_v46 = vld [vmem:[#allocation2 + $0x58] sm:$0x3] }
  0x4c   : > { %v470_v37 = vsel %vm461_vm3, %v468_v30, %v469_v32  ;;  %v1416_v38 = vsel %vm480_vm2, %v535_v33, %v536_v34  ;;  %v488_v40 = vrot.slane %v439_v29, 2  ;;  %v514_v50 = vrot.slane %v432_v43, 1  ;;  %v666_v55 = vld [vmem:[%s1605_s3 + $0x10] sm:$0xff]  ;;  %v667_v56 = vld [vmem:[%s1605_s3 + $0x18] sm:$0xff]  ;;  %s1197_s12 = smov 36   ;;  %v668_v62 = vld [vmem:[%s1605_s3 + $0x20] sm:$0xff] }
  0x4d   : > { %v483_v41 = vsel %vm480_vm2, %v481_v35, %v482_v36  ;;  %v515_v51 = vrot.slane %v433_v45, 1  ;;  %v520_v52 = vrot.slane %v440_v44, 1  ;;  %v521_v53 = vrot.slane %v441_v46, 1  ;;  %v669_v63 = vld [vmem:[%s1605_s3 + $0x28] sm:$0xff]  ;;  %v670_v5 = vld [vmem:[%s1605_s3 + $0x30] sm:$0xff]  ;;  %v671_v6 = vld [vmem:[%s1605_s3 + $0x38] sm:$0xff] }
  0x4e   : > { %v489_v42 = vsel %vm480_vm2, %v487_v39, %v488_v40  ;;  %v1196_v54 = vmov 0.0|0.0   ;;  %v989_v57 = vpack.c.bf16 %v667_v56, %v666_v55  ;;  %v532_v58 = vrot.slane %v432_v43, 2  ;;  %s1198_s6 = smov 44   ;;  %v442_v9 = vld [vmem:[#allocation2 + $0x60] sm:$0xff]  ;;  %v443_v10 = vld [vmem:[#allocation2 + $0x68] sm:$0x3] }
  0x4f   : > { %525 = vrot.lane.b32.xlu0 %v1406_v25, %s1194_s24  ;;  %449 = vrot.lane.b32.xlu1 %v430_v22, %s1192_s9  ;;  %v516_v59 = vsel %vm461_vm3, %v514_v50, %v515_v51  ;;  %v522_v60 = vsel %vm461_vm3, %v520_v52, %v521_v53  ;;  %v533_v61 = vrot.slane %v433_v45, 2  ;;  %v992_v1 = vpack.c.bf16 %v669_v63, %v668_v62  ;;  %s1201_s11 = smov 60   ;;  %v445_v19 = vld [vmem:[#allocation2 + $0x78] sm:$0x3]  ;;  %s773_s21 = smul.u32 (%p1281_p3), 3, %s1170_s18 }
  0x50   : > { %997 = vmatprep.subr.bf16.mxu1 %v1196_v54  ;;  %985 = vmatprep.subr.bf16.mxu0 %v1196_v54  ;;  %v538_v3 = vrot.slane %v440_v44, 2  ;;  %v539_v4 = vrot.slane %v441_v46, 2  ;;  %v995_v7 = vpack.c.bf16 %v671_v6, %v670_v5  ;;  %vm1199_vm4 = vmmov 0  }
  0x51   : > { %1001 = vmatpush3.bf16.msra.mxu1 %v986_v49  ;;  %987 = vmatpush3.bf16.msra.mxu0 %v986_v49  ;;  %v534_v2 = vsel %vm480_vm2, %v532_v58, %v533_v61  ;;  %v561_v13 = vrot.slane %v442_v9, 1  ;;  %v562_v14 = vrot.slane %v443_v10, 1  ;;  %v573_v15 = vrot.slane %v442_v9, 2  ;;  %s774_s26 = ssub.s32 (%p1281_p3), 8, %s773_s21 }
  0x52   : > { %998 = vmatprep.subr.bf16.mxu1 %v1196_v54  ;;  %988 = vmatprep.subr.bf16.mxu0 %v1196_v54  ;;  %v540_v8 = vsel %vm480_vm2, %v538_v3, %v539_v4  ;;  %v574_v17 = vrot.slane %v443_v10, 2  ;;  %v597_v22 = vrot.slane %v445_v19, 1  ;;  %v609_v26 = vrot.slane %v445_v19, 2  ;;  %p775_p10 = scmp.lt.s32.totalorder (%p1281_p3), %s774_s26, 3 }
  0x53   : > { %453 = vrot.lane.b32.xlu0 %v438_v27, %s1192_s9  ;;  %471 = vrot.lane.b32.xlu1 %v464_v31, %s1193_s23  ;;  %v563_v16 = vsel %vm461_vm3, %v561_v13, %v562_v14  ;;  %vm620_vm5 = vcmask 31744   ;;  %vm624_vm6 = vcmask 97280   ;;  %vm628_vm7 = vcmask 130048  }
  0x54   : > { %979 = vmatprep.mubr.msk.f32.mxu1 %vm1199_vm4, %v1188_v0  ;;  %976 = vmatprep.mubr.msk.f32.mxu0 %vm1199_vm4, %v1188_v0  ;;  %v575_v18 = vsel %vm480_vm2, %v573_v15, %v574_v17  ;;  %vm632_vm8 = vcmask 162816   ;;  %vm636_vm9 = vcmask 228352   ;;  %vm640_vm10 = vcmask 261120  }
  0x55   : > { %1002 = vmatpush3.bf16.msra.mxu1 %v989_v57  ;;  %990 = vmatpush3.bf16.msra.mxu0 %v989_v57  ;;  %vm644_vm11 = vcmask 293888   ;;  %vm648_vm12 = vcmask 359424   ;;  %vm652_vm13 = vcmask 392192   ;;  %vm656_vm14 = vcmask 424960  }
  0x56   : > { %999 = vmatprep.subr.bf16.mxu1 %v1196_v54  ;;  %991 = vmatprep.subr.bf16.mxu0 %v1196_v54  ;;  %vm660_vm15 = vcmask 490496   ;;  %vm672_vm0 = vcmask 523264  }
  0x57   : > { %475 = vrot.lane.b32.xlu0 %v470_v37, %s1193_s23  ;;  %543 = vrot.lane.b32.xlu1 %v1416_v38, %s1195_s27 }
  0x59   : > { %1003 = vmatpush3.bf16.msra.mxu1 %v992_v1  ;;  %993 = vmatpush3.bf16.msra.mxu0 %v992_v1 }
  0x5a   : > { %1000 = vmatprep.subr.bf16.mxu1 %v1196_v54  ;;  %994 = vmatprep.subr.bf16.mxu0 %v1196_v54 }
  0x5b   : > { %490 = vrot.lane.b32.xlu0 %v483_v41, %s1191_s7  ;;  %494 = vrot.lane.b32.xlu1 %v489_v42, %s1191_s7 }
  0x5d   : > { %1004 = vmatpush3.bf16.msra.mxu1 %v995_v7  ;;  %996 = vmatpush3.bf16.msra.mxu0 %v995_v7 }
  0x5f   : > { %553 = vrot.lane.b32.xlu0 %v438_v27, %s1195_s27  ;;  %502 = vrot.lane.b32.xlu1 %v432_v43, %s1191_s7 }
  0x63   : > { %506 = vrot.lane.b32.xlu0 %v440_v44, %s1191_s7  ;;  %566 = vrot.lane.b32.xlu1 %v470_v37, %s1197_s12 }
  0x67   : > { %523 = vrot.lane.b32.xlu0 %v516_v59, %s1194_s24  ;;  %527 = vrot.lane.b32.xlu1 %v522_v60, %s1194_s24  ;;  %s1200_s24 = smov 52  }
  0x6b   : > { %578 = vrot.lane.b32.xlu0 %v489_v42, %s1198_s6  ;;  %541 = vrot.lane.b32.xlu1 %v534_v2, %s1195_s27 }
  0x6f   : > { %545 = vrot.lane.b32.xlu0 %v540_v8, %s1195_s27  ;;  %588 = vrot.lane.b32.xlu1 %v440_v44, %s1198_s6 }
  0x73   : > { %551 = vrot.lane.b32.xlu0 %v1387_v12, %s1195_s27  ;;  %555 = vrot.lane.b32.xlu1 %v442_v9, %s1195_s27  ;;  %v444_v12 = vld [vmem:[#allocation2 + $0x70] sm:$0xff]  ;;  %s1620_s27 = sand.u32 1, %s1162_s16  }
  0x74   : > { %v596_v21 = vrot.slane %v444_v12, 1  ;;  %v608_v23 = vrot.slane %v444_v12, 2  ;;  %s1530_s20 = scalar_lea.sflag [#allocation4], %s1620_s27 }
  0x76   : > { %v610_v27 = vsel %vm480_vm2, %v608_v23, %v609_v26 }
  0x77   : > { %601 = vrot.lane.b32.xlu0 %v522_v60, %s1200_s24  ;;  %564 = vrot.lane.b32.xlu1 %v1400_v24, %s1197_s12  ;;  %v598_v24 = vsel %vm461_vm3, %v596_v21, %v597_v22 }
  0x7b   : > { %568 = vrot.lane.b32.xlu0 %v563_v16, %s1197_s12  ;;  %613 = vrot.lane.b32.xlu1 %v540_v8, %s1201_s11 }
  0x7f   : > { %576 = vrot.lane.b32.xlu0 %v1397_v20, %s1198_s6  ;;  %580 = vrot.lane.b32.xlu1 %v575_v18, %s1198_s6 }
  0x83   : > { %586 = vrot.lane.b32.xlu0 %v1385_v11, %s1198_s6  ;;  %590 = vrot.lane.b32.xlu1 %v444_v12, %s1198_s6 }
  0x87   : > { %599 = vrot.lane.b32.xlu0 %v1406_v25, %s1200_s24  ;;  %603 = vrot.lane.b32.xlu1 %v598_v24, %s1200_s24 }
  0x8b   : > { %611 = vrot.lane.b32.xlu0 %v1416_v38, %s1201_s11  ;;  %615 = vrot.lane.b32.xlu1 %v610_v27, %s1201_s11 }
  0xb9   : > { %v505_v20 = vpop.permute.xlu1 %504  ;;  %v452_v28 = vpop.permute.xlu0 %451 }
  0xbd   : > { %v493_v29 = vpop.permute.xlu1 %492  ;;  %v474_v30 = vpop.permute.xlu0 %473 }
  0xbe   : > { %v622_v45 = vsel %vm620_vm5, %v452_v28, %v474_v30 }
  0xbf   : > { %v626_v46 = vsel %vm624_vm6, %v622_v45, %v493_v29 }
  0xc0   : > { %v630_v49 = vsel %vm628_vm7, %v626_v46, %v505_v20 }
  0xc1   : > { %v526_v31 = vpop.permute.xlu0 %525  ;;  %v450_v11 = vpop.permute.xlu1 %449 }
  0xc2   : > { %v634_v52 = vsel %vm632_vm8, %v630_v49, %v526_v31 }
  0xc5   : > { %v454_v32 = vpop.permute.xlu0 %453  ;;  %v472_v33 = vpop.permute.xlu1 %471 }
  0xc6   : > { %v621_v3 = vsel %vm620_vm5, %v450_v11, %v472_v33 }
  0xc9   : > { %v476_v34 = vpop.permute.xlu0 %475  ;;  %v544_v35 = vpop.permute.xlu1 %543 }
  0xca   : > { %v638_v53 = vsel %vm636_vm9, %v634_v52, %v544_v35  ;;  %v623_v4 = vsel %vm620_vm5, %v454_v32, %v476_v34 }
  0xcd   : > { %v491_v36 = vpop.permute.xlu0 %490  ;;  %v495_v37 = vpop.permute.xlu1 %494 }
  0xce   : > { %v625_v5 = vsel %vm624_vm6, %v621_v3, %v491_v36  ;;  %v627_v6 = vsel %vm624_vm6, %v623_v4, %v495_v37 }
  0xd1   : > { %v554_v39 = vpop.permute.xlu0 %553  ;;  %v503_v25 = vpop.permute.xlu1 %502 }
  0xd2   : > { %v642_v54 = vsel %vm640_vm10, %v638_v53, %v554_v39  ;;  %v629_v9 = vsel %vm628_vm7, %v625_v5, %v503_v25 }
  0xd5   : > { %v507_v40 = vpop.permute.xlu0 %506  ;;  %v567_v41 = vpop.permute.xlu1 %566 }
  0xd6   : > { %v646_v57 = vsel %vm644_vm11, %v642_v54, %v567_v41  ;;  %v631_v10 = vsel %vm628_vm7, %v627_v6, %v507_v40 }
  0xd9   : > { %v524_v42 = vpop.permute.xlu0 %523  ;;  %v528_v43 = vpop.permute.xlu1 %527 }
  0xda   : > { %v633_v13 = vsel %vm632_vm8, %v629_v9, %v524_v42 }
  0xdd   : > { %v579_v38 = vpop.permute.xlu0 %578  ;;  %v542_v44 = vpop.permute.xlu1 %541 }
  0xde   : > { %v650_v58 = vsel %vm648_vm12, %v646_v57, %v579_v38  ;;  %v637_v14 = vsel %vm636_vm9, %v633_v13, %v542_v44 }
  0xe1   : > { %v546_v47 = vpop.permute.xlu0 %545  ;;  %v589_v48 = vpop.permute.xlu1 %588 }
  0xe2   : > { %v654_v59 = vsel %vm652_vm13, %v650_v58, %v589_v48 }
  0xe5   : > { %v552_v50 = vpop.permute.xlu0 %551  ;;  %v556_v51 = vpop.permute.xlu1 %555 }
  0xe6   : > { %v641_v16 = vsel %vm640_vm10, %v637_v14, %v552_v50 }
  0xe9   : > { %v602_v55 = vpop.permute.xlu0 %601  ;;  %v565_v56 = vpop.permute.xlu1 %564 }
  0xea   : > { %v658_v60 = vsel %vm656_vm14, %v654_v59, %v602_v55  ;;  %v645_v19 = vsel %vm644_vm11, %v641_v16, %v565_v56 }
  0xed   : > { %v569_v61 = vpop.permute.xlu0 %568  ;;  %v614_v62 = vpop.permute.xlu1 %613 }
  0xee   : > { %v662_v63 = vsel %vm660_vm15, %v658_v60, %v614_v62 }
  0xef   : > { %980 = vmatmul.mubr.msk.f32.vlgmr.msra.gmra.mrb[0].mxu1 %vm672_vm0, %v662_v63 }
  0xf0   : > { %982 = vmatprep.mubr.msk.f32.mxu1 %vm1199_vm4, %v1188_v0  ;;  %v635_v0 = vsel %vm632_vm8, %v631_v10, %v528_v43 }
  0xf1   : > { %v577_v1 = vpop.permute.xlu0 %576  ;;  %v581_v2 = vpop.permute.xlu1 %580  ;;  %v639_v15 = vsel %vm636_vm9, %v635_v0, %v546_v47 }
  0xf2   : > { %v643_v17 = vsel %vm640_vm10, %v639_v15, %v556_v51  ;;  %v649_v22 = vsel %vm648_vm12, %v645_v19, %v577_v1 }
  0xf3   : > { %v647_v21 = vsel %vm644_vm11, %v643_v17, %v569_v61 }
  0xf4   : > { %v651_v23 = vsel %vm648_vm12, %v647_v21, %v581_v2 }
  0xf5   : > { %v587_v7 = vpop.permute.xlu0 %586  ;;  %v591_v8 = vpop.permute.xlu1 %590 }
  0xf6   : > { %v653_v24 = vsel %vm652_vm13, %v649_v22, %v587_v7  ;;  %v655_v26 = vsel %vm652_vm13, %v651_v23, %v591_v8 }
  0xf9   : > { %v600_v18 = vpop.permute.xlu0 %599  ;;  %v604_v12 = vpop.permute.xlu1 %603 }
  0xfa   : > { %v657_v27 = vsel %vm656_vm14, %v653_v24, %v600_v18  ;;  %v659_v20 = vsel %vm656_vm14, %v655_v26, %v604_v12 }
  0xfd   : > { %v612_v28 = vpop.permute.xlu0 %611  ;;  %v616_v29 = vpop.permute.xlu1 %615 }
  0xfe   : > { %v661_v30 = vsel %vm660_vm15, %v657_v27, %v612_v28  ;;  %v663_v31 = vsel %vm660_vm15, %v659_v20, %v616_v29 }
  0xff   : > { %977 = vmatmul.mubr.msk.f32.vlgmr.msra.gmra.mrb[0].mxu0 %vm672_vm0, %v661_v30  ;;  %983 = vmatmul.mubr.msk.f32.gmra.mrb[2].mxu1 %vm672_vm0, %v663_v31 }
 0x1c2   : > { %v753_v11 = vpop.f32.mrb[0].mxu1 }
 0x1c3   : > { %763 = vst.msk [vmem:[%s1374_s13 + $0x8] sm:$0xff] %vm393_vm1, %v753_v11  ;;  %v981_v32 = vpop.f32.mrb[1].mxu1 }
 0x1cd   : > { %772 = sbr.rel (!%p1281_p3) target bundleno = 498 (0x1f2), region = 56 }
 0x1d2   : > { %v748_v33 = vpop.f32.mrb[0].mxu0  ;;  %v758_v34 = vpop.f32.mrb[2].mxu1 }
 0x1d3   : > { %762 = vst.msk [vmem:[%s1374_s13] sm:$0xff] %vm393_vm1, %v748_v33  ;;  %764 = vst.msk [vmem:[%s1374_s13 + $0x10] sm:$0xff] %vm393_vm1, %v758_v34  ;;  %v978_v35 = vpop.f32.mrb[1].mxu0  ;;  %v984_v36 = vpop.f32.mrb[3].mxu1 }
 0x1d4   : > { %s1644_s26 = smov (!%p775_p10, %s774_s26), 3 }
 0x1d5   : > { %s1535_s8 = sshll.u32 %s1644_s26, 7 }
 0x1d6   : > { %s779_s12 = ssub.s32 384, %s1535_s8 }
 0x1d7   : > { %780 = vsyncadd %s1530_s20, %s779_s12  ;;  %p940_p11 = scmp.ne.s32.totalorder %s1535_s8, 0  ;;  %s941_s25 = sshll.u32 %s1174_s19, 3 }
 0x1d8   : > { %s783_s28 = sadd.s32 %s941_s25, %s773_s21  ;;  %s787_s10 = sshll.u32 %s1374_s13, 4  ;;  %s1542_s10 = int_to_ptr.vmem [resolvable:$true] %s787_s10 }
 0x1d9   : > { %s942_s14 = sshll.u32 %s783_s28, 7  ;;  %s1092_s23 = scalar_lea.vmem %s1542_s10, %s1535_s8 }
 0x1da   : > { %s1547_s7 = scalar_lea.hbm %s1606_s4, %s942_s14  ;;  %p1093_p3 = scmp.ne.s32.totalorder %s1542_s10, %s1092_s23 }
 0x1db   : > { %s1202_s30 = smov [#allocation3]  }
 0x1dc   : > { %p1094_p12 = pnand %p1093_p3, %p940_p11  ;;  %s1096_s19 = sshll.u32 %s1202_s30, 4  ;;  %s1097_s19 = int_to_ptr.vmem [resolvable:$false] %s1096_s19 }
 0x1dd   : > { %s1098_s13 = scalar_lea.vmem %s1097_s19, 768  ;;  %p1099_p0 = scmp.lt.s32.totalorder %s1542_s10, %s1097_s19 }
 0x1de   : > { %p1095_p13 = pneg %p1094_p12  ;;  %p1100_p1 = scmp.lt.s32.totalorder %s1098_s13, %s1092_s23 }
 0x1e0   : > { %p1101_p2 = por %p1100_p1, %p1099_p0 }
 0x1e2   : > { %p1102_p4 = pnand %p1101_p2, %p1095_p13 }
 0x1e4   : > { %1105 = shalt.err (!%p1102_p4)
}
 0x1e5   : > { %s1106_s5 = scalar_lea.hbm %s1547_s7, %s1535_s8  ;;  %s1110_s11 = scalar_lea.hbm %s1606_s4, 2048 }
 0x1e6   : > { %p1107_p5 = scmp.ne.s32.totalorder %s1547_s7, %s1106_s5  ;;  %p1111_p9 = scmp.lt.u32.totalorder %s1547_s7, %s1606_s4 }
 0x1e7   : > { %p1112_p10 = scmp.lt.u32.totalorder %s1110_s11, %s1106_s5  ;;  %p1114_p12 = scmp.lt.u32.totalorder %s1106_s5, %s1547_s7 }
 0x1e8   : > { %p1108_p6 = pnand %p1107_p5, %p940_p11 }
 0x1e9   : > { %p1113_p3 = por %p1112_p10, %p1111_p9 }
 0x1ea   : > { %p1109_p7 = pneg %p1108_p6 }
 0x1eb   : > { %p1115_p13 = por %p1114_p12, %p1113_p3 }
 0x1ed   : > { %p1116_p0 = pnand %p1115_p13, %p1109_p7 }
 0x1ef   : > { %1119 = shalt.err (!%p1116_p0)
}
 0x1f0   : > { %s1203_s26 = smov 128   ;;  %s1204_s12 = smov 8  }
 0x1f1   : > { %793 = dma.vmem_to_hbm [thread:$0]  (%p940_p11), %s1542_s10, %s1535_s8, %s1547_s7, %s1530_s20, %s1203_s26, %s1203_s26, %s1204_s12  }
 0x1f2 PF: > { %p1011_p1 = scmp.ge.s32.totalorder %s1186_s22, 2  ;;  %s802_s25 = sand.u32 1, %s1158_s15  }
 0x1f3   : > { %s803_s28 = scalar_lea.sflag [#allocation4], %s802_s25 }
 0x1f4   : > { %p1008_p2 = pnand %p1011_p1, %p1290_p8 }
 0x1f6   : > { %1153 = dma.done.wait (!%p1008_p2), %s803_s28, 384  }
 0x1f7   : > { %1155 = vsyncadd (!%p1008_p2), %s803_s28, 4294966912  ;;  %s17_s22 = sadd.s32 1, %s1186_s22   ;;  %s1621_s14 = sld [smem:[#allocation10_spill]] }
 0x1f8   : > { %p14_p4 = scmp.ge.s32.totalorder %s17_s22, 8   ;;  %s1622_s18 = sld [smem:[#allocation6_spill]] }
 0x1f9   : > { %s1623_s19 = sld [smem:[#allocation7_spill]]  ;;  %s1624_s20 = sld [smem:[#allocation8_spill]] }
 0x1fa   : > { %s1625_s21 = sld [smem:[#allocation9_spill]]  ;;  %s1626_s15 = smov %s1162_s16 }
 0x1fb   : > { %s1627_s16 = smov %s1166_s17  ;;  %16 = sbr.rel (!%p14_p4) target bundleno = 5 (0x5), region = 96 }
 0x1fd   : > { %s1628_s17 = smov %s1621_s14 }
 0x202   :  { %808 = vsyncpa [#allocation4], 1 }
 0x203   :  { %810 = vsyncpa [#allocation4 + $0x1], 1 }

</bundles_post_ra>
